<compile_context>
chip_gen: v7x
topology: tpu7x:2x2x1
jax: 0.10.0
libtpu: 0.0.40
codegen_flags: <defaults>
</compile_context>

<pallas_src>
import jax
import jax.numpy as jnp
from jax import lax
from jax.experimental import pallas as pl
from jax.experimental.pallas import tpu as pltpu


def _attention_kernel(q_ref, x_ref, wq_ref, wkv_ref, o_ref):
    """Single-invocation kernel over full (B, L, F) slabs resident in VMEM.

    q_ref:   (B, Lq, Fin)    bf16 queries
    x_ref:   (B, Lx, Fin)    bf16 key/value source
    wq_ref:  (Fin, Fout)     bf16 Q projection, softmax scale pre-folded in
    wkv_ref: (Fin, 2*Fout)   bf16 fused [Wk | Wv] projection
    o_ref:   (B, Lq, Fout)   bf16 output
    """
    B, Lq, Fin = q_ref.shape
    _, Lx, _ = x_ref.shape
    Fout = wq_ref.shape[1]

    # Flatten batch into the M dim so each projection is one taller MXU matmul
    # (last dim unchanged -> cheap sublane-only reshape; Lq/Lx are %8 guarded).
    q2d = q_ref[...].reshape(B * Lq, Fin)
    x2d = x_ref[...].reshape(B * Lx, Fin)

    # Q projection: 1/sqrt(Fout) already folded into wq on the host.
    # bf16 x bf16 -> f32 accumulate on the MXU.
    Q = jnp.dot(q2d, wq_ref[...], preferred_element_type=jnp.float32)
    Q = Q.reshape(B, Lq, Fout).astype(jnp.bfloat16)

    # Fused K/V projection: one (B*Lx, Fin) @ (Fin, 2*Fout) matmul (N=2*Fout
    # fills the 256-wide MXU on v6e/v7x), then split at the Fout boundary.
    # With Fout a multiple of 128 this slice is lane-tile aligned (free view);
    # for Fout < 128 fall back to two separate (Fin, Fout) dots instead.
    KV = jnp.dot(x2d, wkv_ref[...], preferred_element_type=jnp.float32)
    KV = KV.reshape(B, Lx, 2 * Fout)
    K = KV[:, :, :Fout].astype(jnp.bfloat16)
    V = KV[:, :, Fout:].astype(jnp.bfloat16)

    # scores = Q K^T: contract the feature axis directly, batched over B
    # (no explicit K transpose / relayout). bf16 operands, f32 result.
    scores = lax.dot_general(
        Q, K, (((2,), (2,)), ((0,), (0,))),
        preferred_element_type=jnp.float32)                 # (B, Lq, Lx)

    # Numerically stable softmax over keys (== nn.Softmax(dim=2)).
    # Exact reciprocal: the denominator is only B*Lq values, approx only costs
    # accuracy here.
    m = jnp.max(scores, axis=-1, keepdims=True)
    p = jnp.exp(scores - m)
    denom = jnp.sum(p, axis=-1, keepdims=True)
    attn = (p / denom).astype(jnp.bfloat16)                 # back to bf16 for the MXU

    out = lax.dot_general(
        attn, V, (((2,), (1,)), ((0,), (0,))),
        preferred_element_type=jnp.float32)                 # (B, Lq, Fout)

    o_ref[...] = out.astype(o_ref.dtype)


def prepare_weights(wq, wk, wv):
    """One-time host-side parameter prep (hoisted out of the hot path).

    Torch nn.Linear weights are (Fout, Fin); the kernel wants (Fin, Fout).
    Folds the 1/sqrt(Fout) softmax scale into Wq, fuses Wk/Wv into a single
    (Fin, 2*Fout) matrix, and casts everything to bf16 for the MXU bf16 path.
    """
    Fout = wq.shape[0]
    scale = 1.0 / (Fout ** 0.5)
    wq_t_scaled = (wq.T.astype(jnp.float32) * scale).astype(jnp.bfloat16)
    wkv_t = jnp.concatenate([wk.T, wv.T], axis=1).astype(jnp.bfloat16)
    return wq_t_scaled, wkv_t


def global_graph_net(query, x, wq_t_scaled, wkv_t):
    """query: (B, Lq, Fin), x: (B, Lx, Fin); weights from prepare_weights().

    Returns bf16 (B, Lq, Fout).
    """
    B, Lq, Fin = query.shape
    Bx, Lx, Fin_x = x.shape
    assert B == Bx and Fin == Fin_x
    # Tile-alignment guard: non-multiple-of-8 sequence lengths would silently
    # turn the batch-flatten reshapes into materialized VMEM relayout copies
    # (and would need a key mask for padded rows — see TODO at the top).
    assert Lq % 8 == 0 and Lx % 8 == 0, "pad Lq/Lx to multiples of 8"

    Fout = wq_t_scaled.shape[1]

    # bf16 activations: halves HBM/VMEM traffic and vreg pressure, and puts
    # every matmul on the native bf16 MXU path (f32 accumulation in-kernel).
    query = query.astype(jnp.bfloat16)
    x = x.astype(jnp.bfloat16)

    vmem = pltpu.MemorySpace.VMEM
    return pl.pallas_call(
        _attention_kernel,
        out_shape=jax.ShapeDtypeStruct((B, Lq, Fout), jnp.bfloat16),
        in_specs=[
            pl.BlockSpec(memory_space=vmem),   # query
            pl.BlockSpec(memory_space=vmem),   # x
            pl.BlockSpec(memory_space=vmem),   # wq (scaled, transposed)
            pl.BlockSpec(memory_space=vmem),   # wkv (fused, transposed)
        ],
        out_specs=pl.BlockSpec(memory_space=vmem),
        compiler_params=pltpu.CompilerParams(
            # Explicit scoped-VMEM budget (v5e default is only 16 MiB). 32 MiB
            # is safe on every generation; raise toward ~100 MiB on v5e/v6e
            # when scaling Lx with the whole-slab design.
            vmem_limit_bytes=32 * 1024 * 1024,
        ),
    )(query, x, wq_t_scaled, wkv_t)


def _reference(query, x, wq, wk, wv):
    """Pure f32 JAX reference matching the PyTorch module."""
    Q = jnp.einsum("blf,of->blo", query, wq)
    K = jnp.einsum("blf,of->blo", x, wk)
    V = jnp.einsum("blf,of->blo", x, wv)
    Fout = wq.shape[0]
    scores = jnp.einsum("bqo,bko->bqk", Q, K) / (Fout ** 0.5)
    attn = jax.nn.softmax(scores, axis=2)
    return jnp.einsum("bqk,bko->bqo", attn, V)


if __name__ == "__main__":
    # Small shapes consistent with the module's forward:
    #   batch=2, num_polylines=16 (keys/values), queries=8,
    #   in_features=out_features=128 (module defaults -> lane-dense dims).
    B, Lq, Lx = 2, 8, 16
    IN_FEATURES = 128
    OUT_FEATURES = 128

    key = jax.random.PRNGKey(0)
    k_q, k_x, k_wq, k_wk, k_wv = jax.random.split(key, 5)

    query = jax.random.normal(k_q, (B, Lq, IN_FEATURES), dtype=jnp.float32)
    x = jax.random.normal(k_x, (B, Lx, IN_FEATURES), dtype=jnp.float32)

    # Torch Linear weight layout (out, in), uniform(-1/sqrt(in), 1/sqrt(in)).
    bound = 1.0 / (IN_FEATURES ** 0.5)
    wq = jax.random.uniform(k_wq, (OUT_FEATURES, IN_FEATURES), jnp.float32, -bound, bound)
    wk = jax.random.uniform(k_wk, (OUT_FEATURES, IN_FEATURES), jnp.float32, -bound, bound)
    wv = jax.random.uniform(k_wv, (OUT_FEATURES, IN_FEATURES), jnp.float32, -bound, bound)

    # One-time weight prep (would live with parameter storage in a real model).
    wq_t_scaled, wkv_t = prepare_weights(wq, wk, wv)

    out = global_graph_net(query, x, wq_t_scaled, wkv_t)
    out = jax.block_until_ready(out)

    ref = _reference(query, x, wq, wk, wv)
    assert out.shape == (B, Lq, OUT_FEATURES)
    # bf16 activations/weights with f32 accumulation vs an f32 reference:
    # end-to-end relative deviation is ~1e-2, tolerance set accordingly.
    assert jnp.allclose(out.astype(jnp.float32), ref, atol=2e-2, rtol=2e-2), \
        "mismatch vs JAX reference"

    print("KERNEL_OK")
</pallas_src>

<mosaic_0001>
module attributes {stable_mosaic.version = 11 : i64} {
  func.func @_attention_kernel(%arg0: memref<2x8x128xbf16, #tpu.memory_space<vmem>>, %arg1: memref<2x16x128xbf16, #tpu.memory_space<vmem>>, %arg2: memref<128x128xbf16, #tpu.memory_space<vmem>>, %arg3: memref<128x256xbf16, #tpu.memory_space<vmem>>, %arg4: memref<2x8x128xbf16, #tpu.memory_space<vmem>>) attributes {dimension_semantics = [], scalar_prefetch = 0 : i64, scratch_operands = 0 : i64, tpu.core_type = #tpu.core_type<tc>} {
    %c0 = arith.constant 0 : index
    %c0_0 = arith.constant 0 : index
    %c0_1 = arith.constant 0 : index
    %0 = vector.load %arg0[%c0, %c0_0, %c0_1] : memref<2x8x128xbf16, #tpu.memory_space<vmem>>, vector<2x8x128xbf16>
    %1 = vector.shape_cast %0 : vector<2x8x128xbf16> to vector<16x128xbf16>
    %c0_2 = arith.constant 0 : index
    %c0_3 = arith.constant 0 : index
    %c0_4 = arith.constant 0 : index
    %2 = vector.load %arg1[%c0_2, %c0_3, %c0_4] : memref<2x16x128xbf16, #tpu.memory_space<vmem>>, vector<2x16x128xbf16>
    %3 = vector.shape_cast %2 : vector<2x16x128xbf16> to vector<32x128xbf16>
    %c0_5 = arith.constant 0 : index
    %c0_6 = arith.constant 0 : index
    %4 = vector.load %arg2[%c0_5, %c0_6] : memref<128x128xbf16, #tpu.memory_space<vmem>>, vector<128x128xbf16>
    %cst = arith.constant dense<0.000000e+00> : vector<16x128xf32>
    %5 = tpu.matmul %1, %4, %cst {dimension_numbers = #tpu.dot_dimension_numbers<[1], [0], [0], [1], [0, 0, 1, 1], [], []>} : vector<16x128xbf16>, vector<128x128xbf16>, vector<16x128xf32> -> vector<16x128xf32>
    %6 = vector.shape_cast %5 : vector<16x128xf32> to vector<2x8x128xf32>
    %7 = arith.truncf %6 : vector<2x8x128xf32> to vector<2x8x128xbf16>
    %c0_7 = arith.constant 0 : index
    %c0_8 = arith.constant 0 : index
    %8 = vector.load %arg3[%c0_7, %c0_8] : memref<128x256xbf16, #tpu.memory_space<vmem>>, vector<128x256xbf16>
    %cst_9 = arith.constant dense<0.000000e+00> : vector<32x256xf32>
    %9 = tpu.matmul %3, %8, %cst_9 {dimension_numbers = #tpu.dot_dimension_numbers<[1], [0], [0], [1], [0, 0, 1, 1], [], []>} : vector<32x128xbf16>, vector<128x256xbf16>, vector<32x256xf32> -> vector<32x256xf32>
    %10 = vector.shape_cast %9 : vector<32x256xf32> to vector<2x16x256xf32>
    %11 = vector.extract_strided_slice %10 {offsets = [0, 0, 0], sizes = [2, 16, 128], strides = [1, 1, 1]} : vector<2x16x256xf32> to vector<2x16x128xf32>
    %12 = arith.truncf %11 : vector<2x16x128xf32> to vector<2x16x128xbf16>
    %13 = vector.extract_strided_slice %10 {offsets = [0, 0, 128], sizes = [2, 16, 128], strides = [1, 1, 1]} : vector<2x16x256xf32> to vector<2x16x128xf32>
    %14 = arith.truncf %13 : vector<2x16x128xf32> to vector<2x16x128xbf16>
    %cst_10 = arith.constant dense<0.000000e+00> : vector<2x8x16xf32>
    %15 = tpu.matmul %7, %12, %cst_10 {dimension_numbers = #tpu.dot_dimension_numbers<[2], [2], [1], [1], [0, 0, 0, 1, 1, 1], [0], [0]>} : vector<2x8x128xbf16>, vector<2x16x128xbf16>, vector<2x8x16xf32> -> vector<2x8x16xf32>
    %cst_11 = arith.constant dense<0xFF800000> : vector<2x8xf32>
    %16 = vector.multi_reduction <maximumf>, %15, %cst_11 [2] : vector<2x8x16xf32> to vector<2x8xf32>
    %17 = vector.shape_cast %16 : vector<2x8xf32> to vector<2x8x1xf32>
    %18 = vector.broadcast %17 : vector<2x8x1xf32> to vector<2x8x16xf32>
    %19 = arith.subf %15, %18 : vector<2x8x16xf32>
    %20 = math.exp %19 : vector<2x8x16xf32>
    %cst_12 = arith.constant dense<0.000000e+00> : vector<2x8xf32>
    %21 = vector.multi_reduction <add>, %20, %cst_12 [2] : vector<2x8x16xf32> to vector<2x8xf32>
    %22 = vector.shape_cast %21 : vector<2x8xf32> to vector<2x8x1xf32>
    %23 = vector.broadcast %22 : vector<2x8x1xf32> to vector<2x8x16xf32>
    %24 = arith.divf %20, %23 : vector<2x8x16xf32>
    %25 = arith.truncf %24 : vector<2x8x16xf32> to vector<2x8x16xbf16>
    %cst_13 = arith.constant dense<0.000000e+00> : vector<2x8x128xf32>
    %26 = tpu.matmul %25, %14, %cst_13 {dimension_numbers = #tpu.dot_dimension_numbers<[2], [1], [1], [2], [0, 0, 0, 1, 1, 2], [0], [0]>} : vector<2x8x16xbf16>, vector<2x16x128xbf16>, vector<2x8x128xf32> -> vector<2x8x128xf32>
    %27 = arith.truncf %26 : vector<2x8x128xf32> to vector<2x8x128xbf16>
    %c0_14 = arith.constant 0 : index
    %c0_15 = arith.constant 0 : index
    %c0_16 = arith.constant 0 : index
    %28 = vector.load %arg4[%c0_14, %c0_15, %c0_16] : memref<2x8x128xbf16, #tpu.memory_space<vmem>>, vector<2x8x128xbf16>
    tpu.vector_store %arg4[%c0_14, %c0_15, %c0_16], %27 {strides = array<i32>} : memref<2x8x128xbf16, #tpu.memory_space<vmem>>, vector<2x8x128xbf16>,
    return
  }
}

</mosaic_0001>

<bundles_post_ra>
// kernel: tpu_custom_call.1
= control target key start
LH: loop header
LB: loop body
LE: loop exit
PB: predicated region body
PF: predicated region fallthrough
CT: control target
= control target key end

     0   :  { %9 = vsyncpa [#allocation3], 0  ;;  %s993_s0 = inlined_call_operand.hbm [shape: bf16[2,8,128], index: 0, kind: input, shape index: {}]   ;;  %s994_s1 = inlined_call_operand.hbm [shape: bf16[2,16,128], index: 1, kind: input, shape index: {}]   ;;  %s995_s2 = inlined_call_operand.hbm [shape: bf16[128,128], index: 2, kind: input, shape index: {}]   ;;  %s996_s3 = inlined_call_operand.hbm [shape: bf16[128,256], index: 3, kind: input, shape index: {}]   ;;  %s997_s4 = inlined_call_operand.hbm [shape: bf16[2,8,128], index: 4, kind: output, shape index: {}]  }
   0x1   :  { %10 = vsyncpa [#allocation6], 0 }
   0x2   :  { %11 = vsyncpa [#allocation9], 0 }
   0x3   :  { %12 = vsyncpa [#allocation4], 0  ;;  %s840_s15 = smov [#allocation5]   ;;  %s841_s17 = smov [#allocation2]  }
   0x4   :  { %s30_s16 = sshll.u32 %s840_s15, 4  ;;  %s18_s18 = sshll.u32 %s841_s17, 4  ;;  %s31_s16 = int_to_ptr.vmem [resolvable:$true] %s30_s16  ;;  %s877_s18 = int_to_ptr.vmem [resolvable:$true] %s18_s18 }
   0x5   :  { %s722_s21 = scalar_lea.hbm %s994_s1, 256 }
   0x6   :  { %p723_p0 = scmp.ne.s32.totalorder %s994_s1, %s722_s21  ;;  %p726_p1 = scmp.lt.u32.totalorder %s722_s21, %s994_s1 }
   0x8   :  { %p728_p2 = pnand %p726_p1, %p723_p0 }
   0xa   :  { %731 = shalt.err (!%p728_p2)
}
   0xb   :  { %s732_s26 = scalar_lea.vmem %s31_s16, 256  ;;  %p737_p4 = scmp.lt.s32.totalorder %s31_s16, %s31_s16 }
   0xc   :  { %p733_p3 = scmp.ne.s32.totalorder %s31_s16, %s732_s26  ;;  %p738_p5 = scmp.lt.s32.totalorder %s732_s26, %s732_s26 }
   0xe   :  { %p739_p6 = por %p738_p5, %p737_p4 }
  0x10   :  { %p740_p7 = pnand %p739_p6, %p733_p3 }
  0x12   :  { %743 = shalt.err (!%p740_p7)
}
  0x13   :  { %s842_s27 = smov 64   ;;  %s843_s28 = smov 4  }
  0x14   :  { %36 = dma.hbm_to_vmem [thread:$0]  %s994_s1, 256, %s31_s16, [#allocation6], %s842_s27, %s842_s27, %s843_s28  }
  0x15   :  { %s744_s7 = scalar_lea.hbm %s993_s0, 128 }
  0x16   :  { %p745_p8 = scmp.ne.s32.totalorder %s993_s0, %s744_s7  ;;  %p748_p9 = scmp.lt.u32.totalorder %s744_s7, %s993_s0 }
  0x18   :  { %p750_p10 = pnand %p748_p9, %p745_p8 }
  0x1a   :  { %753 = shalt.err (!%p750_p10)
}
  0x1b   :  { %s754_s12 = scalar_lea.vmem %s877_s18, 128  ;;  %p759_p12 = scmp.lt.s32.totalorder %s877_s18, %s877_s18 }
  0x1c   :  { %p755_p11 = scmp.ne.s32.totalorder %s877_s18, %s754_s12  ;;  %p760_p13 = scmp.lt.s32.totalorder %s754_s12, %s754_s12 }
  0x1e   :  { %p761_p0 = por %p760_p13, %p759_p12 }
  0x20   :  { %p762_p1 = pnand %p761_p0, %p755_p11 }
  0x22   :  { %765 = shalt.err (!%p762_p1)
}
  0x23   :  { %24 = dma.hbm_to_vmem [thread:$0]  %s993_s0, 128, %s877_s18, [#allocation3], %s842_s27, %s842_s27, %s843_s28  }
  0x24   :  { %s844_s14 = smov [#allocation7]   ;;  %s845_s16 = smov [#allocation8]  }
  0x25   :  { %s42_s15 = sshll.u32 %s844_s14, 4  ;;  %s54_s17 = sshll.u32 %s845_s16, 4  ;;  %s43_s15 = int_to_ptr.vmem [resolvable:$true] %s42_s15  ;;  %s914_s17 = int_to_ptr.vmem [resolvable:$true] %s54_s17 }
  0x26   :  { %s766_s21 = scalar_lea.hbm %s995_s2, 1024 }
  0x27   :  { %p767_p2 = scmp.ne.s32.totalorder %s995_s2, %s766_s21  ;;  %p770_p3 = scmp.lt.u32.totalorder %s766_s21, %s995_s2 }
  0x29   :  { %p772_p4 = pnand %p770_p3, %p767_p2 }
  0x2b   :  { %775 = shalt.err (!%p772_p4)
}
  0x2c   :  { %s776_s0 = scalar_lea.vmem %s43_s15, 1024  ;;  %p781_p6 = scmp.lt.s32.totalorder %s43_s15, %s43_s15 }
  0x2d   :  { %p777_p5 = scmp.ne.s32.totalorder %s43_s15, %s776_s0  ;;  %p782_p7 = scmp.lt.s32.totalorder %s776_s0, %s776_s0 }
  0x2f   :  { %p783_p8 = por %p782_p7, %p781_p6 }
  0x31   :  { %p784_p9 = pnand %p783_p8, %p777_p5 }
  0x33   :  { %787 = shalt.err (!%p784_p9)
}
  0x34   :  { %48 = dma.hbm_to_vmem [thread:$0]  %s995_s2, 1024, %s43_s15, [#allocation6], %s842_s27, %s842_s27, %s843_s28  }
  0x35   :  { %s788_s5 = scalar_lea.hbm %s996_s3, 2048 }
  0x36   :  { %p789_p10 = scmp.ne.s32.totalorder %s996_s3, %s788_s5  ;;  %p792_p11 = scmp.lt.u32.totalorder %s788_s5, %s996_s3 }
  0x38   :  { %p794_p12 = pnand %p792_p11, %p789_p10 }
  0x3a   :  { %797 = shalt.err (!%p794_p12)
}
  0x3b   :  { %s798_s10 = scalar_lea.vmem %s914_s17, 2048  ;;  %p803_p0 = scmp.lt.s32.totalorder %s914_s17, %s914_s17 }
  0x3c   :  { %p799_p13 = scmp.ne.s32.totalorder %s914_s17, %s798_s10  ;;  %p804_p1 = scmp.lt.s32.totalorder %s798_s10, %s798_s10 }
  0x3e   :  { %p805_p2 = por %p804_p1, %p803_p0 }
  0x40   :  { %p806_p3 = pnand %p805_p2, %p799_p13 }
  0x42   :  { %809 = shalt.err (!%p806_p3)
}
  0x43   :  { %s846_s2 = smov 128   ;;  %s847_s11 = smov 8  }
  0x44   :  { %60 = dma.hbm_to_vmem [thread:$0]  %s996_s3, 2048, %s914_s17, [#allocation9], %s846_s2, %s846_s2, %s847_s11  }
  0x45   :  { %832 = dma.done.wait [#allocation3], 128  }
  0x46   :  { %833 = vsyncadd [#allocation3], 4294967168 }
  0x47   :  { %834 = dma.done.wait [#allocation6], 1280  }
  0x48   :  { %835 = vsyncadd [#allocation6], 4294966016 }
  0x49   :  { %836 = dma.done.wait [#allocation9], 2048  }
  0x4a   :  { %837 = vsyncadd [#allocation9], 4294965248  ;;  %v848_v0 = vmov 0.0   ;;  %v849_v1 = vmov 0   ;;  %vm850_vm0 = vmmov 0   ;;  %v685_v6 = vld [vmem:[#allocation7] sm:$0xff]  }
  0x4b   :  { %623 = vmatprep.subr.bf16.mxu0 %v848_v0  ;;  %333 = vmatprep.mubr.bf16.mxu1 %v849_v1  ;;  %v679_v2 = vld [vmem:[#allocation8 + $0x4] ss:$8 sps:$4 sm:$0xff]   ;;  %v681_v3 = vld [vmem:[#allocation8] ss:$8 sps:$4 sm:$0xff]   ;;  %v682_v4 = vld [vmem:[#allocation8 + $0x14] ss:$8 sps:$4 sm:$0xff]  }
  0x4c   :  { %639 = vmatprep.mubr.msk.bf16.mxu0 %vm850_vm0, %v848_v0  ;;  %301 = vmatprep.subr.bf16.mxu1 %v679_v2  ;;  %v684_v5 = vld [vmem:[#allocation8 + $0x10] ss:$8 sps:$4 sm:$0xff]   ;;  %v686_v7 = vld [vmem:[#allocation8 + $0x24] ss:$8 sps:$4 sm:$0xff]   ;;  %v688_v9 = vld [vmem:[#allocation8 + $0x20] ss:$8 sps:$4 sm:$0xff]  }
  0x4d   :  { %302 = vmatpush1.bf16.msra.mxu1 %v681_v3  ;;  %624 = vmatpush3.bf16.msra.mxu0 %v685_v6  ;;  %v689_v8 = vld [vmem:[#allocation7 + $0x8] sm:$0xff]   ;;  %v690_v10 = vld [vmem:[#allocation8 + $0x34] ss:$8 sps:$4 sm:$0xff]   ;;  %v692_v12 = vld [vmem:[#allocation8 + $0x30] ss:$8 sps:$4 sm:$0xff]   ;;  %vm438_vm1 = vcmask 130048  }
  0x4e   :  { %303 = vmatprep.subr.bf16.mxu1 %v682_v4  ;;  %625 = vmatprep.subr.bf16.mxu0 %v848_v0  ;;  %v693_v11 = vld [vmem:[#allocation7 + $0x10] sm:$0xff]   ;;  %v694_v13 = vld [vmem:[#allocation8 + $0x44] ss:$8 sps:$4 sm:$0xff]   ;;  %v697_v14 = vld [vmem:[#allocation7 + $0x18] sm:$0xff]   ;;  %s851_s3 = smov [#allocation10]  }
  0x4f   :  { %v696_v15 = vld [vmem:[#allocation8 + $0x40] ss:$8 sps:$4 sm:$0xff]   ;;  %v698_v16 = vld [vmem:[#allocation8 + $0x54] ss:$8 sps:$4 sm:$0xff]   ;;  %v700_v18 = vld [vmem:[#allocation8 + $0x50] ss:$8 sps:$4 sm:$0xff]  }
  0x50   :  { %v701_v17 = vld [vmem:[#allocation7 + $0x20] sm:$0xff]   ;;  %v705_v20 = vld [vmem:[#allocation7 + $0x28] sm:$0xff]   ;;  %v706_v22 = vld [vmem:[#allocation8 + $0x74] ss:$8 sps:$4 sm:$0xff]   ;;  %s558_s13 = sshll.u32 %s851_s3, 4  ;;  %s559_s13 = int_to_ptr.vmem [resolvable:$true] %s558_s13 }
  0x51   :  { %304 = vmatpush1.bf16.msra.mxu1 %v684_v5  ;;  %626 = vmatpush3.bf16.msra.mxu0 %v689_v8  ;;  %v702_v19 = vld [vmem:[#allocation8 + $0x64] ss:$8 sps:$4 sm:$0xff]   ;;  %v704_v21 = vld [vmem:[#allocation8 + $0x60] ss:$8 sps:$4 sm:$0xff]   ;;  %v709_v23 = vld [vmem:[#allocation7 + $0x30] sm:$0xff]   ;;  %s810_s14 = scalar_lea.vmem %s559_s13, 128  ;;  %p815_p5 = scmp.lt.s32.totalorder %s559_s13, %s559_s13 }
  0x52   :  { %305 = vmatprep.subr.bf16.mxu1 %v686_v7  ;;  %627 = vmatprep.subr.bf16.mxu0 %v848_v0  ;;  %v708_v24 = vld [vmem:[#allocation8 + $0x70] ss:$8 sps:$4 sm:$0xff]   ;;  %v712_v27 = vld [vmem:[#allocation2] sm:$0xff]   ;;  %p811_p4 = scmp.ne.s32.totalorder %s559_s13, %s810_s14  ;;  %p816_p6 = scmp.lt.s32.totalorder %s810_s14, %s810_s14 }
  0x53   :  { %v711_v25 = vld [vmem:[#allocation7 + $0x38] sm:$0xff]   ;;  %v710_v26 = vld [vmem:[#allocation5] sm:$0xff]  }
  0x54   :  { %v713_v28 = vld [vmem:[#allocation5 + $0x8] sm:$0xff]   ;;  %p817_p7 = por %p816_p6, %p815_p5 }
  0x55   :  { %306 = vmatpush1.bf16.msra.mxu1 %v688_v9  ;;  %628 = vmatpush3.bf16.msra.mxu0 %v693_v11 }
  0x56   :  { %307 = vmatprep.subr.bf16.mxu1 %v690_v10  ;;  %629 = vmatprep.subr.bf16.mxu0 %v848_v0  ;;  %p818_p8 = pnand %p817_p7, %p811_p4 }
  0x59   :  { %308 = vmatpush1.bf16.msra.mxu1 %v692_v12  ;;  %630 = vmatpush3.bf16.msra.mxu0 %v697_v14 }
  0x5a   :  { %309 = vmatprep.subr.bf16.mxu1 %v694_v13  ;;  %631 = vmatprep.subr.bf16.mxu0 %v848_v0 }
  0x5d   :  { %310 = vmatpush1.bf16.msra.mxu1 %v696_v15  ;;  %632 = vmatpush3.bf16.msra.mxu0 %v701_v17 }
  0x5e   :  { %311 = vmatprep.subr.bf16.mxu1 %v698_v16  ;;  %633 = vmatprep.subr.bf16.mxu0 %v848_v0 }
  0x61   :  { %312 = vmatpush1.bf16.msra.mxu1 %v700_v18  ;;  %634 = vmatpush3.bf16.msra.mxu0 %v705_v20 }
  0x62   :  { %313 = vmatprep.subr.bf16.mxu1 %v702_v19  ;;  %635 = vmatprep.subr.bf16.mxu0 %v848_v0 }
  0x65   :  { %314 = vmatpush1.bf16.msra.mxu1 %v704_v21  ;;  %636 = vmatpush3.bf16.msra.mxu0 %v709_v23 }
  0x66   :  { %315 = vmatprep.subr.bf16.mxu1 %v706_v22  ;;  %637 = vmatprep.subr.bf16.mxu0 %v848_v0 }
  0x69   :  { %316 = vmatpush1.bf16.msra.mxu1 %v708_v24  ;;  %638 = vmatpush3.bf16.msra.mxu0 %v711_v25 }
  0x6a   :  { %655 = vmatprep.subr.bf16.mxu1 %v848_v0  ;;  %643 = vmatprep.subr.bf16.mxu0 %v848_v0 }
  0x6c   :  { %334 = vmatmul.mubr.bf16.vlgmr.msra.gmra.mrb[0].mxu1 %v710_v26  ;;  %640 = vmatmul.mubr.bf16.vlgmr.msra.gmra.mrb[0].mxu0 %v712_v27 }
  0x6d   :  { %343 = vmatprep.mubr.bf16.mxu1 %v849_v1  ;;  %645 = vmatprep.mubr.msk.bf16.mxu0 %vm850_vm0, %v848_v0 }
  0x74   :  { %344 = vmatmul.mubr.bf16.gmra.mrb[4].mxu1 %v713_v28 }
  0x75   :  { %657 = vmatprep.mubr.msk.bf16.mxu1 %vm850_vm0, %v848_v0 }
 0x13f   :  { %v335_v29 = vpop.f32.mrb[0].mxu1  ;;  %v184_v32 = vpop.f32.mrb[0].mxu0 }
 0x140   :  { %v337_v30 = vpop.f32.mrb[1].mxu1  ;;  %v641_v35 = vpop.f32.mrb[1].mxu0  ;;  %v191_v39 = vpack.c.bf16 %v184_v32, %v184_v32 }
 0x141   :  { %v339_v31 = vpop.f32.mrb[2].mxu1  ;;  %v187_v37 = vpop.f32.mrb[2].mxu0 }
 0x142   :  { %v354_v33 = vpack.c.bf16 %v339_v31, %v335_v29  ;;  %v341_v34 = vpop.f32.mrb[3].mxu1  ;;  %v642_v38 = vpop.f32.mrb[3].mxu0  ;;  %v192_v46 = vpack.c.bf16 %v187_v37, %v187_v37 }
 0x143   :  { %v356_v36 = vpack.c.bf16 %v341_v34, %v337_v30 }
 0x144   :  { %644 = vmatpush3.bf16.xpose.msra.mxu0 %v354_v33 }
 0x145   :  { %656 = vmatpush3.bf16.msra.mxu1 %v356_v36  ;;  %649 = vmatprep.subr.bf16.mxu0 %v848_v0 }
 0x147   :  { %v345_v40 = vpop.f32.mrb[4].mxu1 }
 0x148   :  { %v347_v41 = vpop.f32.mrb[5].mxu1 }
 0x149   :  { %v349_v42 = vpop.f32.mrb[6].mxu1 }
 0x14a   :  { %v355_v43 = vpack.c.bf16 %v349_v42, %v345_v40  ;;  %v351_v44 = vpop.f32.mrb[7].mxu1 }
 0x14b   :  { %v357_v45 = vpack.c.bf16 %v351_v44, %v347_v41  ;;  %646 = vmatmul.mubr.bf16.vlgmr.msra.gmra.mrb[4].mxu0 %v191_v39 }
 0x14c   :  { %650 = vmatpush3.bf16.xpose.msra.mxu0 %v355_v43  ;;  %651 = vmatprep.mubr.msk.bf16.mxu0 %vm850_vm0, %v848_v0 }
 0x14d   :  { %661 = vmatprep.subr.bf16.mxu0 %v848_v0 }
 0x153   :  { %652 = vmatmul.mubr.bf16.vlgmr.msra.gmra.mrb[8].mxu0 %v192_v46 }
 0x154   :  { %662 = vmatpush3.bf16.msra.mxu0 %v357_v45  ;;  %663 = vmatprep.mubr.msk.bf16.mxu0 %vm850_vm0, %v848_v0 }
 0x21e   :  { %v392_v47 = vpop.f32.mrb[4].mxu0 }
 0x21f   :  { %v647_v48 = vpop.f32.mrb[5].mxu0  ;;  %v439_v49 = vsel %vm438_vm1, %v392_v47, -inf }
 0x220   :  { %440 = vmax.xlane.f32.xlu0 %v439_v49  ;;  %v395_v50 = vpop.f32.mrb[6].mxu0 }
 0x221   :  { %v648_v51 = vpop.f32.mrb[7].mxu0 }
 0x226   :  { %v432_v52 = vpop.f32.mrb[8].mxu0 }
 0x227   :  { %v653_v53 = vpop.f32.mrb[9].mxu0  ;;  %v442_v54 = vsel %vm438_vm1, %v432_v52, -inf }
 0x228   :  { %443 = vmax.xlane.f32.xlu0 %v442_v54  ;;  %v435_v55 = vpop.f32.mrb[10].mxu0 }
 0x229   :  { %v654_v56 = vpop.f32.mrb[11].mxu0 }
 0x2ad   :  { %v441_v57 = vpop.xlane.xlu0 %440 }
 0x2ae   :  { %v445_v58 = vsub.f32 %v392_v47, %v441_v57 }
 0x2b0   :  { %v447_v59 = vmul.f32 1.442695, %v445_v58 }
 0x2b2   :  { %714 = vpow2.f32 %v447_v59 }
 0x2b5   :  { %v444_v60 = vpop.xlane.xlu0 %443 }
 0x2b6   :  { %v446_v61 = vsub.f32 %v432_v52, %v444_v60 }
 0x2b8   :  { %v449_v62 = vmul.f32 1.442695, %v446_v61 }
 0x2ba   :  { %716 = vpow2.f32 %v449_v62 }
 0x2bc   :  { %v715_v63 = vpop.eup %714 }
 0x2bd   :  { %v451_v0 = vsel %vm438_vm1, %v715_v63, 0.0 }
 0x2be   :  { %452 = vadd.xlane.f32.xlu1 %v451_v0 }
 0x2c4   :  { %v717_v1 = vpop.eup %716 }
 0x2c5   :  { %v454_v2 = vsel %vm438_vm1, %v717_v1, 0.0 }
 0x2c6   :  { %455 = vadd.xlane.f32.xlu1 %v454_v2 }
 0x34b   :  { %v453_v3 = vpop.xlane.xlu1 %452 }
 0x34c   :  { %718 = vrcp.f32 %v453_v3 }
 0x353   :  { %v456_v4 = vpop.xlane.xlu1 %455 }
 0x354   :  { %720 = vrcp.f32 %v456_v4 }
 0x356   :  { %v719_v5 = vpop.eup %718 }
 0x357   :  { %v458_v6 = vmul.f32 %v719_v5, %v715_v63 }
 0x359   :  { %v461_v7 = vpack.c.bf16 %v458_v6, %v458_v6 }
 0x35b   :  { %658 = vmatmul.mubr.msk.bf16.vlgmr.msra.gmra.mrb[8].mxu1 %vm438_vm1, %v461_v7 }
 0x35e   :  { %v721_v8 = vpop.eup %720 }
 0x35f   :  { %v460_v9 = vmul.f32 %v721_v8, %v717_v1 }
 0x361   :  { %v462_v10 = vpack.c.bf16 %v460_v9, %v460_v9 }
 0x363   :  { %664 = vmatmul.mubr.msk.bf16.vlgmr.msra.gmra.mrb[12].mxu0 %vm438_vm1, %v462_v10 }
 0x42e   :  { %v500_v11 = vpop.f32.mrb[8].mxu1 }
 0x42f   :  { %v659_v12 = vpop.f32.mrb[9].mxu1 }
 0x430   :  { %v503_v13 = vpop.f32.mrb[10].mxu1 }
 0x431   :  { %v660_v14 = vpop.f32.mrb[11].mxu1 }
 0x436   :  { %v543_v15 = vpop.f32.mrb[12].mxu0 }
 0x437   :  { %v604_v16 = vpack.c.bf16 %v543_v15, %v500_v11  ;;  %v665_v17 = vpop.f32.mrb[13].mxu0 }
 0x438   :  { %v546_v18 = vpop.f32.mrb[14].mxu0 }
 0x439   :  { %605 = vst [vmem:[#allocation10] sm:$0xff] %v604_v16   ;;  %v666_v19 = vpop.f32.mrb[15].mxu0 }
 0x43a   :  { %821 = shalt.err (!%p818_p8)
}
 0x43b   :  { %s822_s17 = scalar_lea.hbm %s997_s4, 128 }
 0x43c   :  { %p823_p9 = scmp.ne.s32.totalorder %s997_s4, %s822_s17  ;;  %p826_p10 = scmp.lt.u32.totalorder %s822_s17, %s997_s4 }
 0x43e   :  { %p828_p11 = pnand %p826_p10, %p823_p9 }
 0x440   :  { %831 = shalt.err (!%p828_p11)
}
 0x441   :  { %564 = dma.vmem_to_hbm [thread:$0]  %s559_s13, 128, %s997_s4, [#allocation4], %s842_s27, %s842_s27, %s843_s28  }
 0x442   :  { %838 = dma.done.wait [#allocation4], 128  }
 0x443   :  { %839 = vsyncadd [#allocation4], 4294967168 }
 0x444   :  { %568 = vsyncpa [#allocation3], 1 }
 0x445   :  { %569 = vsyncpa [#allocation6], 1 }
 0x446   :  { %570 = vsyncpa [#allocation9], 1 }
 0x447   :  { %571 = vsyncpa [#allocation4], 1 }

</bundles_post_ra>
